<compile_context>
chip_gen: v5e
topology: v5e:2x2
jax: 0.10.0
libtpu: 0.0.40
codegen_flags: <defaults>
</compile_context>

<pallas_src>
import functools

import jax
import jax.numpy as jnp
from jax.experimental import pallas as pl
from jax.experimental.pallas import tpu as pltpu


def _round_up(x, m):
    return (x + m - 1) // m * m


def _moving_avg_kernel(x_ref, o_ref, xpad_ref, *, kernel_size, stride, pad,
                       time_chunk):
    # x_ref:    (TB, L, C)      unpadded input tile
    # o_ref:    (TB, L_out, C)  output tile
    # xpad_ref: (TB, L_pad, C)  VMEM scratch holding the replicate-padded seq
    TB, L, C = x_ref.shape
    L_out = o_ref.shape[1]

    # --- Build the replicate-padded sequence in VMEM (no extra HBM traffic).
    xpad_ref[:, pl.ds(pad, L), :] = x_ref[...]
    if pad > 0:
        first = x_ref[:, 0:1, :]          # (TB, 1, C)
        last = x_ref[:, L - 1:L, :]       # (TB, 1, C)
        xpad_ref[:, pl.ds(0, pad), :] = jnp.broadcast_to(first, (TB, pad, C))
        xpad_ref[:, pl.ds(pad + L, pad), :] = jnp.broadcast_to(last, (TB, pad, C))

    inv_k = 1.0 / kernel_size

    # --- Sliding-window average, chunked over the output time axis so the
    # fp32 accumulator stays a handful of vregs (K loads + 1 store per output
    # chunk) instead of one giant (L_out, C) value that Mosaic would spill.
    for s in range(0, L_out, time_chunk):
        n = min(time_chunk, L_out - s)
        acc = jnp.zeros((TB, n, C), jnp.float32)
        # kernel_size is small and static; this unrolls into a short add chain.
        for k in range(kernel_size):
            if stride == 1:
                win = xpad_ref[:, pl.ds(s + k, n), :]
            else:
                win = xpad_ref[:, pl.ds(s * stride + k, n, stride), :]
            acc = acc + win.astype(jnp.float32)
        o_ref[:, pl.ds(s, n), :] = (acc * inv_k).astype(o_ref.dtype)


def moving_avg(x, kernel_size, stride):
    """x: (B, L, C) -> (B, L_out, C), matching the PyTorch moving_avg module."""
    assert kernel_size >= 1 and stride >= 1
    B, L, C = x.shape
    pad = (kernel_size - 1) // 2
    L_pad = L + 2 * pad
    L_out = (L_pad - kernel_size) // stride + 1
    orig_C = C

    # Lane density: for large, lane-misaligned channel counts pad C up to a
    # multiple of 128 (small relative overhead, unmasked stores).  Small C
    # keeps the full-extent block to avoid inflating HBM traffic.
    # TODO(synk): for very small C (e.g. 7/21) a (B, C, L) layout with time on
    # the lane axis would be denser still; skipped to avoid extra HBM transposes.
    if C > 128 and C % 128 != 0:
        Cp = _round_up(C, 128)
        x = jnp.pad(x, ((0, 0), (0, 0), (0, Cp - C)))
        C = Cp

    itemsize = jnp.dtype(x.dtype).itemsize

    # --- Batch tile TB from a VMEM budget that is safe on v5e/v6e/v7x:
    # 2x double-buffered input block + 2x output block + padded scratch.
    vmem_budget = 16 * 1024 * 1024
    bytes_per_batch_row = (2 * L + 2 * L_out + L_pad) * C * itemsize
    TB = max(1, vmem_budget // max(1, bytes_per_batch_row))
    TB = min(TB, B)
    if B >= 2:
        # Keep >= 2 grid steps so v7x megacore can split across its 2 cores.
        TB = min(TB, pl.cdiv(B, 2))
    grid_b = pl.cdiv(B, TB)

    # --- Time-chunk size: keep the fp32 accumulator chunk around ~1 MiB.
    acc_budget = 1 * 1024 * 1024
    time_chunk = max(8, acc_budget // max(1, TB * C * 4))
    time_chunk = min(_round_up(time_chunk, 8), _round_up(L_out, 8))

    kernel = functools.partial(
        _moving_avg_kernel,
        kernel_size=kernel_size,
        stride=stride,
        pad=pad,
        time_chunk=time_chunk,
    )

    cost = pl.CostEstimate(
        flops=B * L_out * C * (kernel_size + 1),
        transcendentals=0,
        bytes_accessed=(B * L * C + B * L_out * C) * itemsize,
    )

    out = pl.pallas_call(
        kernel,
        out_shape=jax.ShapeDtypeStruct((B, L_out, C), x.dtype),
        grid_spec=pltpu.PrefetchScalarGridSpec(
            num_scalar_prefetch=0,
            grid=(grid_b,),
            in_specs=[pl.BlockSpec((TB, L, C), lambda b: (b, 0, 0))],
            out_specs=pl.BlockSpec((TB, L_out, C), lambda b: (b, 0, 0)),
            scratch_shapes=[pltpu.VMEM((TB, L_pad, C), x.dtype)],
        ),
        compiler_params=pltpu.CompilerParams(
            dimension_semantics=("parallel",),
            vmem_limit_bytes=32 * 1024 * 1024,
        ),
        cost_estimate=cost,
    )(x)

    if C != orig_C:
        out = out[..., :orig_C]
    return out


def _moving_avg_ref(x, kernel_size, stride):
    """Pure-JAX reference mirroring the PyTorch forward exactly."""
    pad = (kernel_size - 1) // 2
    front = jnp.repeat(x[:, 0:1, :], pad, axis=1)
    end = jnp.repeat(x[:, -1:, :], pad, axis=1)
    xp = jnp.concatenate([front, x, end], axis=1)  # (B, L_pad, C)
    L_pad = xp.shape[1]
    L_out = (L_pad - kernel_size) // stride + 1
    windows = jnp.stack(
        [xp[:, t * stride: t * stride + kernel_size, :] for t in range(L_out)],
        axis=1,
    )  # (B, L_out, K, C)
    return jnp.mean(windows, axis=2)


if __name__ == "__main__":
    # Small shapes consistent with the module: (batch, seq_len, channels).
    B, L, C = 2, 8, 32
    kernel_size, stride = 5, 1

    key = jax.random.PRNGKey(0)
    x = jax.random.normal(key, (B, L, C), dtype=jnp.float32)

    out = moving_avg(x, kernel_size, stride)
    out = jax.block_until_ready(out)

    ref = _moving_avg_ref(x, kernel_size, stride)
    assert out.shape == ref.shape, (out.shape, ref.shape)
    assert jnp.allclose(out, ref, atol=1e-5, rtol=1e-5), "mismatch vs reference"

    print("KERNEL_OK")
</pallas_src>

<mosaic_0001>
module attributes {stable_mosaic.version = 11 : i64} {
  func.func @_moving_avg_kernel(%arg0: i32, %arg1: memref<1x8x32xf32, #tpu.memory_space<vmem>>, %arg2: memref<1x8x32xf32, #tpu.memory_space<vmem>>, %arg3: memref<1x12x32xf32, #tpu.memory_space<vmem>>) attributes {dimension_semantics = [#tpu.dimension_semantics<parallel>], iteration_bounds = array<i64: 2>, scalar_prefetch = 0 : i64, scratch_operands = 1 : i64, tpu.core_type = #tpu.core_type<tc>, window_params = [{transform_indices = @transform_0, window_bounds = array<i64: 1, 8, 32>}, {transform_indices = @transform_1, window_bounds = array<i64: 1, 8, 32>}]} {
    %c0 = arith.constant 0 : index
    %c0_0 = arith.constant 0 : index
    %c0_1 = arith.constant 0 : index
    %0 = vector.load %arg1[%c0, %c0_0, %c0_1] : memref<1x8x32xf32, #tpu.memory_space<vmem>>, vector<1x8x32xf32>
    %c0_2 = arith.constant 0 : index
    %c2 = arith.constant 2 : index
    %c0_3 = arith.constant 0 : index
    %1 = vector.load %arg3[%c0_2, %c2, %c0_3] : memref<1x12x32xf32, #tpu.memory_space<vmem>>, vector<1x8x32xf32>
    tpu.vector_store %arg3[%c0_2, %c2, %c0_3], %0 {strides = array<i32>} : memref<1x12x32xf32, #tpu.memory_space<vmem>>, vector<1x8x32xf32>,
    %c0_4 = arith.constant 0 : index
    %c0_5 = arith.constant 0 : index
    %c0_6 = arith.constant 0 : index
    %2 = vector.load %arg1[%c0_4, %c0_5, %c0_6] : memref<1x8x32xf32, #tpu.memory_space<vmem>>, vector<1x1x32xf32>
    %c0_7 = arith.constant 0 : index
    %c7 = arith.constant 7 : index
    %c0_8 = arith.constant 0 : index
    %3 = vector.load %arg1[%c0_7, %c7, %c0_8] : memref<1x8x32xf32, #tpu.memory_space<vmem>>, vector<1x1x32xf32>
    %4 = vector.shape_cast %2 : vector<1x1x32xf32> to vector<1x1x32xf32>
    %5 = vector.broadcast %4 : vector<1x1x32xf32> to vector<1x2x32xf32>
    %c0_9 = arith.constant 0 : index
    %c0_10 = arith.constant 0 : index
    %c0_11 = arith.constant 0 : index
    %6 = vector.load %arg3[%c0_9, %c0_10, %c0_11] : memref<1x12x32xf32, #tpu.memory_space<vmem>>, vector<1x2x32xf32>
    tpu.vector_store %arg3[%c0_9, %c0_10, %c0_11], %5 {strides = array<i32>} : memref<1x12x32xf32, #tpu.memory_space<vmem>>, vector<1x2x32xf32>,
    %7 = vector.shape_cast %3 : vector<1x1x32xf32> to vector<1x1x32xf32>
    %8 = vector.broadcast %7 : vector<1x1x32xf32> to vector<1x2x32xf32>
    %c0_12 = arith.constant 0 : index
    %c10 = arith.constant 10 : index
    %c0_13 = arith.constant 0 : index
    %9 = vector.load %arg3[%c0_12, %c10, %c0_13] : memref<1x12x32xf32, #tpu.memory_space<vmem>>, vector<1x2x32xf32>
    tpu.vector_store %arg3[%c0_12, %c10, %c0_13], %8 {strides = array<i32>} : memref<1x12x32xf32, #tpu.memory_space<vmem>>, vector<1x2x32xf32>,
    %cst = arith.constant 0.000000e+00 : f32
    %10 = vector.broadcast %cst : f32 to vector<1x8x32xf32>
    %c0_14 = arith.constant 0 : index
    %c0_15 = arith.constant 0 : index
    %c0_16 = arith.constant 0 : index
    %11 = vector.load %arg3[%c0_14, %c0_15, %c0_16] : memref<1x12x32xf32, #tpu.memory_space<vmem>>, vector<1x8x32xf32>
    %12 = arith.addf %10, %11 : vector<1x8x32xf32>
    %c0_17 = arith.constant 0 : index
    %c1 = arith.constant 1 : index
    %c0_18 = arith.constant 0 : index
    %13 = vector.load %arg3[%c0_17, %c1, %c0_18] : memref<1x12x32xf32, #tpu.memory_space<vmem>>, vector<1x8x32xf32>
    %14 = arith.addf %12, %13 : vector<1x8x32xf32>
    %c0_19 = arith.constant 0 : index
    %c2_20 = arith.constant 2 : index
    %c0_21 = arith.constant 0 : index
    %15 = vector.load %arg3[%c0_19, %c2_20, %c0_21] : memref<1x12x32xf32, #tpu.memory_space<vmem>>, vector<1x8x32xf32>
    %16 = arith.addf %14, %15 : vector<1x8x32xf32>
    %c0_22 = arith.constant 0 : index
    %c3 = arith.constant 3 : index
    %c0_23 = arith.constant 0 : index
    %17 = vector.load %arg3[%c0_22, %c3, %c0_23] : memref<1x12x32xf32, #tpu.memory_space<vmem>>, vector<1x8x32xf32>
    %18 = arith.addf %16, %17 : vector<1x8x32xf32>
    %c0_24 = arith.constant 0 : index
    %c4 = arith.constant 4 : index
    %c0_25 = arith.constant 0 : index
    %19 = vector.load %arg3[%c0_24, %c4, %c0_25] : memref<1x12x32xf32, #tpu.memory_space<vmem>>, vector<1x8x32xf32>
    %20 = arith.addf %18, %19 : vector<1x8x32xf32>
    %cst_26 = arith.constant 2.000000e-01 : f32
    %21 = vector.broadcast %cst_26 : f32 to vector<1x8x32xf32>
    %22 = arith.mulf %20, %21 : vector<1x8x32xf32>
    %c0_27 = arith.constant 0 : index
    %c0_28 = arith.constant 0 : index
    %c0_29 = arith.constant 0 : index
    %23 = vector.load %arg2[%c0_27, %c0_28, %c0_29] : memref<1x8x32xf32, #tpu.memory_space<vmem>>, vector<1x8x32xf32>
    tpu.vector_store %arg2[%c0_27, %c0_28, %c0_29], %22 {strides = array<i32>} : memref<1x8x32xf32, #tpu.memory_space<vmem>>, vector<1x8x32xf32>,
    return
  }
  func.func @transform_0(%arg0: i32) -> (i32, i32, i32) {
    %c0_i32 = arith.constant 0 : i32
    %c0_i32_0 = arith.constant 0 : i32
    %c0_i32_1 = arith.constant 0 : i32
    return %arg0, %c0_i32, %c0_i32_0 : i32, i32, i32
  }
  func.func @transform_1(%arg0: i32) -> (i32, i32, i32) {
    %c0_i32 = arith.constant 0 : i32
    %c0_i32_0 = arith.constant 0 : i32
    %c0_i32_1 = arith.constant 0 : i32
    return %arg0, %c0_i32, %c0_i32_0 : i32, i32, i32
  }
}

</mosaic_0001>

<bundles_post_ra>
// kernel: tpu_custom_call.1
= control target key start
LH: loop header
LB: loop body
LE: loop exit
PB: predicated region body
PF: predicated region fallthrough
CT: control target
= control target key end

     0   :  { %6 = vsyncpa [#allocation4], 0  ;;  %s539_s0 = inlined_call_operand.hbm [shape: f32[2,8,32], index: 0, kind: input, shape index: {}]   ;;  %s540_s1 = inlined_call_operand.hbm [shape: f32[2,8,32], index: 1, kind: output, shape index: {}]  }
   0x1   :  { %8 = vsyncpa [#allocation4 + $0x1], 0 }
   0x2   :  { %9 = vsyncpa [#allocation5], 0 }
   0x3   :  { %11 = vsyncpa [#allocation5 + $0x1], 0  ;;  %s410_s6 = smov 0   ;;  %s412_s7 = smov 0  }
   0x4   :  { %s414_s8 = smov 0   ;;  %s416_s9 = smov 0  }
   0x5 LB: > { %s431_s10 = sadd.s32 4294967295, %s398_s9   ;;  %s242_s11 = sadd.s32 4294967294, %s398_s9   ;;  %s398_s9 = sphi %s416_s9, %s550_s9   ;;  %s394_s8 = sphi %s414_s8, %s549_s8   ;;  %s390_s7 = sphi %s412_s7, %s548_s7   ;;  %s386_s6 = sphi %s410_s6, %s547_s6  }
   0x6   : > { %s435_s12 = sadd.s32 1, %s398_s9   ;;  %s24_s13 = sadd.s32 1, %s394_s8 }
   0x7   : > { %s21_s14 = ssub.s32 %s398_s9, %s435_s12  ;;  %p31_p0 = scmp.ne.s32.totalorder %s394_s8, %s390_s7 }
   0x8   : > { %p22_p1 = scmp.eq.s32.totalorder %s21_s14, 0  ;;  %p32_p2 = scmp.eq.s32.totalorder %s398_s9, 0 }
   0x9   : > { %p37_p3 = scmp.ne.s32.totalorder %s390_s7, %s386_s6  ;;  %p38_p4 = scmp.eq.s32.totalorder %s431_s10, 0 }
   0xa   : > { %s447_s15 = scalar_select %p22_p1, %s394_s8, %s24_s13  }
   0xb   : > { %p449_p5 = por %p32_p2, %p31_p0  ;;  %p453_p6 = por %p38_p4, %p37_p3 }
   0xc   : > { %p61_p7 = scmp.eq.s32.totalorder %s431_s10, 1  ;;  %p67_p8 = scmp.eq.s32.totalorder %s242_s11, 1 }
   0xd   : > { %p266_p10 = scmp.lt.s32.totalorder %s398_s9, 2  ;;  %s87_s20 = sand.u32 1, %s394_s8  }
   0xe   : > { %p460_p11 = por %p61_p7, %p31_p0  ;;  %p464_p12 = por %p67_p8, %p37_p3 }
   0xf   : > { %s246_s21 = sshll.u32 %s398_s9, 3  ;;  %s245_s22 = sshll.u32 %s87_s20, 3 }
  0x10   : > { %s95_s25 = scalar_lea.hbm %s539_s0, %s246_s21  ;;  %s91_s27 = scalar_lea.vmem [#allocation3], %s245_s22 }
  0x11   : > { %s97_s26 = sshll.u32 %s95_s25, 4  ;;  %s99_s28 = sshll.u32 %s91_s27, 4  ;;  %s98_s26 = int_to_ptr.hbm [resolvable:$true] %s97_s26  ;;  %s100_s28 = int_to_ptr.vmem [resolvable:$true] %s99_s28 }
  0x12   : > { %p475_p13 = pnand %p266_p10, %p449_p5  ;;  %p247_p0 = scmp.ge.s32.totalorder %s398_s9, 1 }
  0x13   : > { %p104_p1 = scmp.lt.s32.totalorder %s398_s9, 3  ;;  %s88_s30 = scalar_lea.sflag [#allocation4], %s87_s20 }
  0x14   : > { %s302_s2 = sshra.s32 %s98_s26, 4  ;;  %p306_p3 = pneg %p475_p13  ;;  %s303_s2 = int_to_ptr.hbm [resolvable:$true] %s302_s2 }
  0x15   : > { %s304_s3 = scalar_lea.hbm %s303_s2, 8  ;;  %s309_s11 = scalar_lea.hbm %s539_s0, 16 }
  0x16   : > { %p305_p2 = scmp.ne.s32.totalorder %s303_s2, %s304_s3  ;;  %p310_p5 = scmp.lt.s32.totalorder %s303_s2, %s539_s0 }
  0x17   : > { %p311_p8 = scmp.lt.s32.totalorder %s309_s11, %s304_s3 }
  0x18   : > { %p307_p4 = pnand %p306_p3, %p305_p2 }
  0x19   : > { %p312_p10 = por %p311_p8, %p310_p5 }
  0x1a   : > { %p308_p7 = pneg %p307_p4 }
  0x1c   : > { %p313_p9 = pnand %p312_p10, %p308_p7 }
  0x1e   : > { %316 = shalt.err (!%p313_p9)
}
  0x1f   : > { %261 = dma.hbm_to_vmem [thread:$0]  (!%p475_p13), %s98_s26, 128, %s100_s28, %s88_s30  }
  0x20   : > { %p105_p2 = pnand %p247_p0, %p104_p1 }
  0x21   : > { %s496_s16 = sand.u32 (!%p105_p2), 1, %s390_s7  }
  0x22   : > { %108 = sbr.rel (%p105_p2) target bundleno = 64 (0x40), region = 24  ;;  %s248_s20 = sshll.u32 (!%p105_p2), %s496_s16, 3 }
  0x23   : > { %s111_s21 = scalar_lea.sflag (!%p105_p2), [#allocation4], %s496_s16  ;;  %s114_s22 = scalar_lea.vmem (!%p105_p2), [#allocation3], %s248_s20 }
  0x27   : > { %377 = dma.done.wait (%p453_p6), %s111_s21, 128  }
  0x28   : > { %379 = vsyncadd (%p453_p6), %s111_s21, 4294967168  ;;  %vm135_vm0 = vcmask 261120   ;;  %vm140_vm1 = vcmask 254976   ;;  %v134_v0 = vld [vmem:[%s114_s22] sm:$0xff]  ;;  %s251_s23 = sshll.u32 %s431_s10, 3  ;;  %s133_s26 = scalar_lea.vmem [#allocation6], %s248_s20 }
  0x29   : > { %v300_v1 = vld [vmem:[%s114_s22] ss:$0 sm:$0xff]  ;;  %136 = vst.msk [vmem:[#allocation2 + $0x2] sm:$0xff] %vm135_vm0, %v134_v0  ;;  %v301_v2 = vld [vmem:[%s114_s22 + $0x7] ss:$0 sm:$0xff]  ;;  %s167_s25 = scalar_lea.hbm %s540_s1, %s251_s23  ;;  %s169_s27 = sshll.u32 %s133_s26, 4  ;;  %s170_s27 = int_to_ptr.vmem [resolvable:$true] %s169_s27 }
  0x2a   : > { %141 = vst.msk [vmem:[#allocation2] sm:$0x3] %vm140_vm1, %v300_v1  ;;  %s171_s28 = sshll.u32 %s167_s25, 4  ;;  %s157_s10 = scalar_lea.sflag [#allocation5], %s496_s16  ;;  %s172_s28 = int_to_ptr.hbm [resolvable:$true] %s171_s28 }
  0x2b   : > { %143 = vst.msk [vmem:[#allocation2 + $0xa] sm:$0x3] %vm140_vm1, %v301_v2  ;;  %s346_s29 = sshra.s32 %s172_s28, 4  ;;  %s352_s4 = scalar_lea.hbm %s540_s1, 16  ;;  %s347_s29 = int_to_ptr.hbm [resolvable:$true] %s346_s29 }
  0x2c   : > { %s348_s30 = scalar_lea.hbm %s347_s29, 8  ;;  %p353_p0 = scmp.lt.s32.totalorder %s347_s29, %s540_s1 }
  0x2d   : > { %p349_p6 = scmp.ne.s32.totalorder %s347_s29, %s348_s30  ;;  %p354_p1 = scmp.lt.s32.totalorder %s352_s4, %s348_s30 }
  0x2f   : > { %p350_p9 = pnand %p349_p6, %p460_p11  ;;  %p355_p3 = por %p354_p1, %p353_p0 }
  0x30   : > { %v148_v6 = vld [vmem:[#allocation2 + $0x2] sm:$0xff] }
  0x31   : > { %v144_v3 = vld [vmem:[#allocation2] sm:$0xff]  ;;  %p351_p13 = pneg %p350_p9 }
  0x32   : > { %v146_v4 = vld [vmem:[#allocation2 + $0x1] sm:$0xff] }
  0x33   : > { %v147_v5 = vadd.f32 %v146_v4, %v144_v3  ;;  %v150_v8 = vld [vmem:[#allocation2 + $0x3] sm:$0xff]  ;;  %p356_p4 = pnand %p355_p3, %p351_p13 }
  0x34   : > { %v152_v10 = vld [vmem:[#allocation2 + $0x4] sm:$0xff] }
  0x35   : > { %v149_v7 = vadd.f32 %v148_v6, %v147_v5 }
  0x37   : > { %v151_v9 = vadd.f32 %v150_v8, %v149_v7 }
  0x39   : > { %v153_v11 = vadd.f32 %v152_v10, %v151_v9 }
  0x3b   : > { %v154_v12 = vmul.f32 0.2, %v153_v11 }
  0x3d   : > { %155 = vst.msk [vmem:[%s133_s26] sm:$0xff] %vm135_vm0, %v154_v12 }
  0x3e   : > { %359 = shalt.err (!%p356_p4)
}
  0x3f   : > { %256 = dma.vmem_to_hbm [thread:$0]  (%p460_p11), %s170_s27, 128, %s172_s28, %s157_s10  }
  0x40 PF: > { %s183_s13 = sand.u32 1, %s386_s6   ;;  %p546_p7 = scmp.ge.s32.totalorder %s398_s9, 2 }
  0x41   : > { %s184_s14 = scalar_lea.sflag [#allocation5], %s183_s13 }
  0x42   : > { %p263_p5 = pnand %p546_p7, %p464_p12 }
  0x44   : > { %p264_p8 = pneg %p263_p5 }
  0x46   : > { %381 = dma.done.wait (%p264_p8), %s184_s14, 128  }
  0x47   : > { %383 = vsyncadd (%p264_p8), %s184_s14, 4294967168  ;;  %p14_p10 = scmp.ge.s32.totalorder %s435_s12, 4   ;;  %s547_s6 = smov %s390_s7 }
  0x48   : > { %s548_s7 = smov %s394_s8  ;;  %s549_s8 = smov %s447_s15 }
  0x49   : > { %s550_s9 = smov %s435_s12  ;;  %16 = sbr.rel (!%p14_p10) target bundleno = 5 (0x5), region = 69 }
  0x4e   :  { %190 = vsyncpa [#allocation4], 1 }
  0x4f   :  { %192 = vsyncpa [#allocation4 + $0x1], 1 }
  0x50   :  { %193 = vsyncpa [#allocation5], 1 }
  0x51   :  { %195 = vsyncpa [#allocation5 + $0x1], 1 }

</bundles_post_ra>
